<compile_context>
chip_gen: v7x
topology: tpu7x:2x2x1
jax: 0.10.0
libtpu: 0.0.40
codegen_flags: <defaults>
</compile_context>

<pallas_src>
import functools

import jax
import jax.numpy as jnp
from jax import lax
from jax.experimental import pallas as pl
from jax.experimental.pallas import tpu as pltpu


def _round_up(x, m):
    return ((x + m - 1) // m) * m


def _complex_conv_kernel(xm_ref, xh_ref, w_ref, b_ref, o_ref, acc_ref, *,
                         KH, KW, W, Cin, TN):
    # xm_ref : (1, Cin, TN)        main input tile, flattened spatial on lanes
    # xh_ref : (1, Cin, HB)        halo = head of the next tile (same array)
    # w_ref  : (COUTP, KH*KW*Cin)  fused weight, tap-major / channel-minor
    # b_ref  : (COUTP, 1)          fused bias (f32)
    # o_ref  : (1, COUTP, TN)      lane-dense output tile
    # acc_ref: (COUTP, TN)         f32 accumulator (VMEM scratch)

    # Stitch the halo'd window: lane j <-> flat input position t*TN + j.
    # Both pieces are 128-lane aligned so the concat is just vreg placement.
    xw = jnp.concatenate([xm_ref[0], xh_ref[0]], axis=-1)      # (Cin, TN + HB)

    # Init accumulator with the bias (broadcast over lanes), then add K*K
    # per-tap MXU dots.  Each tap is a static lane shift of the window; no
    # im2col patch is ever materialised in vregs.
    acc_ref[...] = jnp.broadcast_to(b_ref[...], acc_ref.shape)
    for kh in range(KH):
        for kw in range(KW):
            kk = kh * KW + kw
            s = kh * W + kw                                    # static shift
            acc_ref[...] += jnp.dot(
                w_ref[:, kk * Cin:(kk + 1) * Cin],             # (COUTP, Cin)
                xw[:, s:s + TN],                               # (Cin, TN)
                preferred_element_type=jnp.float32)

    o_ref[0] = acc_ref[...].astype(o_ref.dtype)


def complex_conv2d(x_nchw, w_r, w_i, b_r, b_i, ksize, *, tn_cap=2048):
    """x_nchw: (B, Cin, H, W). w_*: (Cout/2, Cin/2, K, K). b_*: (Cout/2,)."""
    B, Cin, H, Wd = x_nchw.shape
    coh, cih, KH, KW = w_r.shape
    assert KH == ksize and KW == ksize and 2 * cih == Cin
    Cout = 2 * coh
    OH, OW = H - KH + 1, Wd - KW + 1
    HW = H * Wd
    OL = OH * Wd                      # output positions computed per image
    KK = KH * KW
    dtype = x_nchw.dtype
    itemsize = jnp.dtype(dtype).itemsize

    # ---- fuse the 4 convs into one block-structured conv (weight-side only) ----
    w_top = jnp.concatenate([w_r, -w_i], axis=1)               # (Cout/2, Cin, K, K)
    w_bot = jnp.concatenate([w_i, w_r], axis=1)                # (Cout/2, Cin, K, K)
    w_full = jnp.concatenate([w_top, w_bot], axis=0)           # (Cout, Cin, K, K)
    b_full = jnp.concatenate([b_r - b_i, b_r + b_i])           # (Cout,)

    COUTP = _round_up(Cout, 8)                                 # sublane-aligned rows
    # (Cout, Cin, KH, KW) -> (COUTP, KK*Cin), tap-major / channel-minor.
    w2d = jnp.transpose(w_full, (0, 2, 3, 1)).reshape(Cout, KK * Cin)
    w2d = jnp.pad(w2d, ((0, COUTP - Cout), (0, 0))).astype(dtype)
    b2d = jnp.pad(b_full, (0, COUTP - Cout)).reshape(COUTP, 1).astype(jnp.float32)

    # ---- spatial tiling over the flattened (row-major) image ----
    halo = (KH - 1) * Wd + (KW - 1)          # max tap shift
    HB = _round_up(max(halo, 1), 128)        # halo block width (lanes) >= halo
    TN = min(_round_up(OL, 128), tn_cap)     # lane-dense main tile
    TN = _round_up(max(TN, HB), HB)          # multiple of HB so halo blocks align
    T = pl.cdiv(OL, TN)                      # spatial tiles per image
    NHB = pl.cdiv(HW, HB)                    # HB-blocks covering the input
    TNB = TN // HB                           # TN expressed in HB-blocks

    # Input stays exactly as produced upstream: NCHW -> (B, Cin, H*W) is a free
    # reshape; no pad / transpose / window materialisation in HBM.
    x_flat = x_nchw.reshape(B, Cin, HW)

    # VMEM budget derived from actual usage (2x headroom), not a blanket 48 MiB.
    vmem_usage = (2 * Cin * TN * itemsize        # main input block (double buffered)
                  + 2 * Cin * HB * itemsize      # halo input block
                  + 2 * COUTP * TN * itemsize    # output block
                  + COUTP * TN * 4               # f32 accumulator scratch
                  + 2 * (COUTP * KK * Cin + COUTP) * 4)
    vmem_limit = int(max(4 * 1024 * 1024, min(2 * vmem_usage, 32 * 1024 * 1024)))

    kernel = functools.partial(_complex_conv_kernel,
                               KH=KH, KW=KW, W=Wd, Cin=Cin, TN=TN)

    out_flat = pl.pallas_call(
        kernel,
        out_shape=jax.ShapeDtypeStruct((B, COUTP, T * TN), dtype),
        grid_spec=pltpu.PrefetchScalarGridSpec(
            num_scalar_prefetch=0,
            grid=(B, T),
            in_specs=[
                # main tile: output positions [t*TN, (t+1)*TN)
                pl.BlockSpec((1, Cin, TN), lambda b, t: (b, 0, t)),
                # halo: first HB input positions of tile t+1 (clamped for the
                # last tile, whose kept outputs never read past the image).
                pl.BlockSpec((1, Cin, HB),
                             lambda b, t: (b, 0, jnp.minimum((t + 1) * TNB, NHB - 1))),
                pl.BlockSpec((COUTP, KK * Cin), lambda b, t: (0, 0)),
                pl.BlockSpec((COUTP, 1), lambda b, t: (0, 0)),
            ],
            out_specs=pl.BlockSpec((1, COUTP, TN), lambda b, t: (b, 0, t)),
            scratch_shapes=[pltpu.VMEM((COUTP, TN), jnp.float32)],
        ),
        compiler_params=pltpu.CompilerParams(
            # Tiles carry their own halo -> fully independent grid steps.
            # TODO(synk): on v7x, confirm megacore sharding in the Mosaic dump
            # and switch the larger axis to pltpu.CORE_PARALLEL if serial.
            dimension_semantics=("parallel", "parallel"),
            vmem_limit_bytes=vmem_limit,
        ),
    )(x_flat, x_flat, w2d, b2d)

    # Epilogue: keep real channels / computed positions, drop the K-1 wrap
    # columns.  One fused slice+reshape+slice (single strided copy under jit).
    out = out_flat[:, :Cout, :OL].reshape(B, Cout, OH, Wd)[:, :, :, :OW]
    return out


def _reference(x_nchw, w_r, w_i, b_r, b_i):
    """Pure-JAX reference following the torch forward literally."""
    C = x_nchw.shape[1]
    x_r = x_nchw[:, :C // 2]
    x_i = x_nchw[:, C // 2:]

    def conv(x, w, b):
        y = lax.conv_general_dilated(
            x, w, window_strides=(1, 1), padding="VALID",
            dimension_numbers=("NCHW", "OIHW", "NCHW"))
        return y + b[None, :, None, None]

    mr_kr = conv(x_r, w_r, b_r)
    mi_ki = conv(x_i, w_i, b_i)
    mi_kr = conv(x_i, w_r, b_r)
    mr_ki = conv(x_r, w_i, b_i)
    return jnp.concatenate([mr_kr - mi_ki, mr_ki + mi_kr], axis=1)


if __name__ == "__main__":
    # Module config: ComplexConv2D(in_channel=4, out_channel=8, ksize=3)
    B, Cin, H, W = 2, 4, 16, 16
    Cout, K = 8, 3
    cih, coh = Cin // 2, Cout // 2

    key = jax.random.PRNGKey(0)
    kx, kwr, kwi, kbr, kbi = jax.random.split(key, 5)

    x = jax.random.normal(kx, (B, Cin, H, W), dtype=jnp.float32)
    # kaiming-normal-like deterministic init for conv weights, small biases
    fan_in = cih * K * K
    std = (2.0 / fan_in) ** 0.5
    w_r = std * jax.random.normal(kwr, (coh, cih, K, K), dtype=jnp.float32)
    w_i = std * jax.random.normal(kwi, (coh, cih, K, K), dtype=jnp.float32)
    b_r = 0.1 * jax.random.normal(kbr, (coh,), dtype=jnp.float32)
    b_i = 0.1 * jax.random.normal(kbi, (coh,), dtype=jnp.float32)

    fwd = jax.jit(lambda xx, wr, wi, br, bi: complex_conv2d(xx, wr, wi, br, bi, ksize=K))
    out = jax.block_until_ready(fwd(x, w_r, w_i, b_r, b_i))
    ref = jax.block_until_ready(_reference(x, w_r, w_i, b_r, b_i))

    assert out.shape == (B, Cout, H - K + 1, W - K + 1), out.shape
    max_err = float(jnp.max(jnp.abs(out - ref)))
    assert jnp.allclose(out, ref, atol=1e-4, rtol=1e-4), max_err

    print("KERNEL_OK")
</pallas_src>

<mosaic_0001>
module attributes {stable_mosaic.version = 11 : i64} {
  func.func @_complex_conv_kernel(%arg0: i32, %arg1: i32, %arg2: memref<1x4x256xf32, #tpu.memory_space<vmem>>, %arg3: memref<1x4x128xf32, #tpu.memory_space<vmem>>, %arg4: memref<8x36xf32, #tpu.memory_space<vmem>>, %arg5: memref<8x1xf32, #tpu.memory_space<vmem>>, %arg6: memref<1x8x256xf32, #tpu.memory_space<vmem>>, %arg7: memref<8x256xf32, #tpu.memory_space<vmem>>) attributes {dimension_semantics = [#tpu.dimension_semantics<parallel>, #tpu.dimension_semantics<parallel>], iteration_bounds = array<i64: 2, 1>, scalar_prefetch = 0 : i64, scratch_operands = 1 : i64, tpu.core_type = #tpu.core_type<tc>, window_params = [{transform_indices = @transform_0, window_bounds = array<i64: 1, 4, 256>}, {transform_indices = @transform_1, window_bounds = array<i64: 1, 4, 128>}, {pipeline_mode = #tpu.pipeline_mode<synchronous>, transform_indices = @transform_2, window_bounds = array<i64: 8, 36>}, {pipeline_mode = #tpu.pipeline_mode<synchronous>, transform_indices = @transform_3, window_bounds = array<i64: 8, 1>}, {transform_indices = @transform_4, window_bounds = array<i64: 1, 8, 256>}]} {
    %c0 = arith.constant 0 : index
    %c0_0 = arith.constant 0 : index
    %c0_1 = arith.constant 0 : index
    %0 = vector.load %arg2[%c0, %c0_0, %c0_1] : memref<1x4x256xf32, #tpu.memory_space<vmem>>, vector<1x4x256xf32>
    %1 = vector.shape_cast %0 : vector<1x4x256xf32> to vector<4x256xf32>
    %c0_2 = arith.constant 0 : index
    %c0_3 = arith.constant 0 : index
    %c0_4 = arith.constant 0 : index
    %2 = vector.load %arg3[%c0_2, %c0_3, %c0_4] : memref<1x4x128xf32, #tpu.memory_space<vmem>>, vector<1x4x128xf32>
    %3 = vector.shape_cast %2 : vector<1x4x128xf32> to vector<4x128xf32>
    %4 = tpu.concatenate %1, %3 in 1 : vector<4x256xf32>, vector<4x128xf32> -> vector<4x384xf32>
    %c0_5 = arith.constant 0 : index
    %c0_6 = arith.constant 0 : index
    %5 = vector.load %arg5[%c0_5, %c0_6] : memref<8x1xf32, #tpu.memory_space<vmem>>, vector<8x1xf32>
    %6 = vector.shape_cast %5 : vector<8x1xf32> to vector<8x1xf32>
    %7 = vector.broadcast %6 : vector<8x1xf32> to vector<8x256xf32>
    %c0_7 = arith.constant 0 : index
    %c0_8 = arith.constant 0 : index
    %8 = vector.load %arg7[%c0_7, %c0_8] : memref<8x256xf32, #tpu.memory_space<vmem>>, vector<8x256xf32>
    tpu.vector_store %arg7[%c0_7, %c0_8], %7 {strides = array<i32>} : memref<8x256xf32, #tpu.memory_space<vmem>>, vector<8x256xf32>,
    %c0_9 = arith.constant 0 : index
    %c0_10 = arith.constant 0 : index
    %9 = vector.load %arg7[%c0_9, %c0_10] : memref<8x256xf32, #tpu.memory_space<vmem>>, vector<8x256xf32>
    %c0_11 = arith.constant 0 : index
    %c0_12 = arith.constant 0 : index
    %10 = vector.load %arg4[%c0_11, %c0_12] : memref<8x36xf32, #tpu.memory_space<vmem>>, vector<8x4xf32>
    %11 = vector.extract_strided_slice %4 {offsets = [0, 0], sizes = [4, 256], strides = [1, 1]} : vector<4x384xf32> to vector<4x256xf32>
    %cst = arith.constant dense<0.000000e+00> : vector<8x256xf32>
    %12 = tpu.matmul %10, %11, %cst {dimension_numbers = #tpu.dot_dimension_numbers<[1], [0], [0], [1], [0, 0, 1, 1], [], []>} : vector<8x4xf32>, vector<4x256xf32>, vector<8x256xf32> -> vector<8x256xf32>
    %13 = arith.addf %9, %12 : vector<8x256xf32>
    %c0_13 = arith.constant 0 : index
    %c0_14 = arith.constant 0 : index
    %14 = vector.load %arg7[%c0_13, %c0_14] : memref<8x256xf32, #tpu.memory_space<vmem>>, vector<8x256xf32>
    tpu.vector_store %arg7[%c0_13, %c0_14], %13 {strides = array<i32>} : memref<8x256xf32, #tpu.memory_space<vmem>>, vector<8x256xf32>,
    %c0_15 = arith.constant 0 : index
    %c0_16 = arith.constant 0 : index
    %15 = vector.load %arg7[%c0_15, %c0_16] : memref<8x256xf32, #tpu.memory_space<vmem>>, vector<8x256xf32>
    %c0_17 = arith.constant 0 : index
    %c4 = arith.constant 4 : index
    %16 = vector.load %arg4[%c0_17, %c4] : memref<8x36xf32, #tpu.memory_space<vmem>>, vector<8x4xf32>
    %17 = vector.extract_strided_slice %4 {offsets = [0, 1], sizes = [4, 256], strides = [1, 1]} : vector<4x384xf32> to vector<4x256xf32>
    %cst_18 = arith.constant dense<0.000000e+00> : vector<8x256xf32>
    %18 = tpu.matmul %16, %17, %cst_18 {dimension_numbers = #tpu.dot_dimension_numbers<[1], [0], [0], [1], [0, 0, 1, 1], [], []>} : vector<8x4xf32>, vector<4x256xf32>, vector<8x256xf32> -> vector<8x256xf32>
    %19 = arith.addf %15, %18 : vector<8x256xf32>
    %c0_19 = arith.constant 0 : index
    %c0_20 = arith.constant 0 : index
    %20 = vector.load %arg7[%c0_19, %c0_20] : memref<8x256xf32, #tpu.memory_space<vmem>>, vector<8x256xf32>
    tpu.vector_store %arg7[%c0_19, %c0_20], %19 {strides = array<i32>} : memref<8x256xf32, #tpu.memory_space<vmem>>, vector<8x256xf32>,
    %c0_21 = arith.constant 0 : index
    %c0_22 = arith.constant 0 : index
    %21 = vector.load %arg7[%c0_21, %c0_22] : memref<8x256xf32, #tpu.memory_space<vmem>>, vector<8x256xf32>
    %c0_23 = arith.constant 0 : index
    %c8 = arith.constant 8 : index
    %22 = vector.load %arg4[%c0_23, %c8] : memref<8x36xf32, #tpu.memory_space<vmem>>, vector<8x4xf32>
    %23 = vector.extract_strided_slice %4 {offsets = [0, 2], sizes = [4, 256], strides = [1, 1]} : vector<4x384xf32> to vector<4x256xf32>
    %cst_24 = arith.constant dense<0.000000e+00> : vector<8x256xf32>
    %24 = tpu.matmul %22, %23, %cst_24 {dimension_numbers = #tpu.dot_dimension_numbers<[1], [0], [0], [1], [0, 0, 1, 1], [], []>} : vector<8x4xf32>, vector<4x256xf32>, vector<8x256xf32> -> vector<8x256xf32>
    %25 = arith.addf %21, %24 : vector<8x256xf32>
    %c0_25 = arith.constant 0 : index
    %c0_26 = arith.constant 0 : index
    %26 = vector.load %arg7[%c0_25, %c0_26] : memref<8x256xf32, #tpu.memory_space<vmem>>, vector<8x256xf32>
    tpu.vector_store %arg7[%c0_25, %c0_26], %25 {strides = array<i32>} : memref<8x256xf32, #tpu.memory_space<vmem>>, vector<8x256xf32>,
    %c0_27 = arith.constant 0 : index
    %c0_28 = arith.constant 0 : index
    %27 = vector.load %arg7[%c0_27, %c0_28] : memref<8x256xf32, #tpu.memory_space<vmem>>, vector<8x256xf32>
    %c0_29 = arith.constant 0 : index
    %c12 = arith.constant 12 : index
    %28 = vector.load %arg4[%c0_29, %c12] : memref<8x36xf32, #tpu.memory_space<vmem>>, vector<8x4xf32>
    %29 = vector.extract_strided_slice %4 {offsets = [0, 16], sizes = [4, 256], strides = [1, 1]} : vector<4x384xf32> to vector<4x256xf32>
    %cst_30 = arith.constant dense<0.000000e+00> : vector<8x256xf32>
    %30 = tpu.matmul %28, %29, %cst_30 {dimension_numbers = #tpu.dot_dimension_numbers<[1], [0], [0], [1], [0, 0, 1, 1], [], []>} : vector<8x4xf32>, vector<4x256xf32>, vector<8x256xf32> -> vector<8x256xf32>
    %31 = arith.addf %27, %30 : vector<8x256xf32>
    %c0_31 = arith.constant 0 : index
    %c0_32 = arith.constant 0 : index
    %32 = vector.load %arg7[%c0_31, %c0_32] : memref<8x256xf32, #tpu.memory_space<vmem>>, vector<8x256xf32>
    tpu.vector_store %arg7[%c0_31, %c0_32], %31 {strides = array<i32>} : memref<8x256xf32, #tpu.memory_space<vmem>>, vector<8x256xf32>,
    %c0_33 = arith.constant 0 : index
    %c0_34 = arith.constant 0 : index
    %33 = vector.load %arg7[%c0_33, %c0_34] : memref<8x256xf32, #tpu.memory_space<vmem>>, vector<8x256xf32>
    %c0_35 = arith.constant 0 : index
    %c16 = arith.constant 16 : index
    %34 = vector.load %arg4[%c0_35, %c16] : memref<8x36xf32, #tpu.memory_space<vmem>>, vector<8x4xf32>
    %35 = vector.extract_strided_slice %4 {offsets = [0, 17], sizes = [4, 256], strides = [1, 1]} : vector<4x384xf32> to vector<4x256xf32>
    %cst_36 = arith.constant dense<0.000000e+00> : vector<8x256xf32>
    %36 = tpu.matmul %34, %35, %cst_36 {dimension_numbers = #tpu.dot_dimension_numbers<[1], [0], [0], [1], [0, 0, 1, 1], [], []>} : vector<8x4xf32>, vector<4x256xf32>, vector<8x256xf32> -> vector<8x256xf32>
    %37 = arith.addf %33, %36 : vector<8x256xf32>
    %c0_37 = arith.constant 0 : index
    %c0_38 = arith.constant 0 : index
    %38 = vector.load %arg7[%c0_37, %c0_38] : memref<8x256xf32, #tpu.memory_space<vmem>>, vector<8x256xf32>
    tpu.vector_store %arg7[%c0_37, %c0_38], %37 {strides = array<i32>} : memref<8x256xf32, #tpu.memory_space<vmem>>, vector<8x256xf32>,
    %c0_39 = arith.constant 0 : index
    %c0_40 = arith.constant 0 : index
    %39 = vector.load %arg7[%c0_39, %c0_40] : memref<8x256xf32, #tpu.memory_space<vmem>>, vector<8x256xf32>
    %c0_41 = arith.constant 0 : index
    %c20 = arith.constant 20 : index
    %40 = vector.load %arg4[%c0_41, %c20] : memref<8x36xf32, #tpu.memory_space<vmem>>, vector<8x4xf32>
    %41 = vector.extract_strided_slice %4 {offsets = [0, 18], sizes = [4, 256], strides = [1, 1]} : vector<4x384xf32> to vector<4x256xf32>
    %cst_42 = arith.constant dense<0.000000e+00> : vector<8x256xf32>
    %42 = tpu.matmul %40, %41, %cst_42 {dimension_numbers = #tpu.dot_dimension_numbers<[1], [0], [0], [1], [0, 0, 1, 1], [], []>} : vector<8x4xf32>, vector<4x256xf32>, vector<8x256xf32> -> vector<8x256xf32>
    %43 = arith.addf %39, %42 : vector<8x256xf32>
    %c0_43 = arith.constant 0 : index
    %c0_44 = arith.constant 0 : index
    %44 = vector.load %arg7[%c0_43, %c0_44] : memref<8x256xf32, #tpu.memory_space<vmem>>, vector<8x256xf32>
    tpu.vector_store %arg7[%c0_43, %c0_44], %43 {strides = array<i32>} : memref<8x256xf32, #tpu.memory_space<vmem>>, vector<8x256xf32>,
    %c0_45 = arith.constant 0 : index
    %c0_46 = arith.constant 0 : index
    %45 = vector.load %arg7[%c0_45, %c0_46] : memref<8x256xf32, #tpu.memory_space<vmem>>, vector<8x256xf32>
    %c0_47 = arith.constant 0 : index
    %c24 = arith.constant 24 : index
    %46 = vector.load %arg4[%c0_47, %c24] : memref<8x36xf32, #tpu.memory_space<vmem>>, vector<8x4xf32>
    %47 = vector.extract_strided_slice %4 {offsets = [0, 32], sizes = [4, 256], strides = [1, 1]} : vector<4x384xf32> to vector<4x256xf32>
    %cst_48 = arith.constant dense<0.000000e+00> : vector<8x256xf32>
    %48 = tpu.matmul %46, %47, %cst_48 {dimension_numbers = #tpu.dot_dimension_numbers<[1], [0], [0], [1], [0, 0, 1, 1], [], []>} : vector<8x4xf32>, vector<4x256xf32>, vector<8x256xf32> -> vector<8x256xf32>
    %49 = arith.addf %45, %48 : vector<8x256xf32>
    %c0_49 = arith.constant 0 : index
    %c0_50 = arith.constant 0 : index
    %50 = vector.load %arg7[%c0_49, %c0_50] : memref<8x256xf32, #tpu.memory_space<vmem>>, vector<8x256xf32>
    tpu.vector_store %arg7[%c0_49, %c0_50], %49 {strides = array<i32>} : memref<8x256xf32, #tpu.memory_space<vmem>>, vector<8x256xf32>,
    %c0_51 = arith.constant 0 : index
    %c0_52 = arith.constant 0 : index
    %51 = vector.load %arg7[%c0_51, %c0_52] : memref<8x256xf32, #tpu.memory_space<vmem>>, vector<8x256xf32>
    %c0_53 = arith.constant 0 : index
    %c28 = arith.constant 28 : index
    %52 = vector.load %arg4[%c0_53, %c28] : memref<8x36xf32, #tpu.memory_space<vmem>>, vector<8x4xf32>
    %53 = vector.extract_strided_slice %4 {offsets = [0, 33], sizes = [4, 256], strides = [1, 1]} : vector<4x384xf32> to vector<4x256xf32>
    %cst_54 = arith.constant dense<0.000000e+00> : vector<8x256xf32>
    %54 = tpu.matmul %52, %53, %cst_54 {dimension_numbers = #tpu.dot_dimension_numbers<[1], [0], [0], [1], [0, 0, 1, 1], [], []>} : vector<8x4xf32>, vector<4x256xf32>, vector<8x256xf32> -> vector<8x256xf32>
    %55 = arith.addf %51, %54 : vector<8x256xf32>
    %c0_55 = arith.constant 0 : index
    %c0_56 = arith.constant 0 : index
    %56 = vector.load %arg7[%c0_55, %c0_56] : memref<8x256xf32, #tpu.memory_space<vmem>>, vector<8x256xf32>
    tpu.vector_store %arg7[%c0_55, %c0_56], %55 {strides = array<i32>} : memref<8x256xf32, #tpu.memory_space<vmem>>, vector<8x256xf32>,
    %c0_57 = arith.constant 0 : index
    %c0_58 = arith.constant 0 : index
    %57 = vector.load %arg7[%c0_57, %c0_58] : memref<8x256xf32, #tpu.memory_space<vmem>>, vector<8x256xf32>
    %c0_59 = arith.constant 0 : index
    %c32 = arith.constant 32 : index
    %58 = vector.load %arg4[%c0_59, %c32] : memref<8x36xf32, #tpu.memory_space<vmem>>, vector<8x4xf32>
    %59 = vector.extract_strided_slice %4 {offsets = [0, 34], sizes = [4, 256], strides = [1, 1]} : vector<4x384xf32> to vector<4x256xf32>
    %cst_60 = arith.constant dense<0.000000e+00> : vector<8x256xf32>
    %60 = tpu.matmul %58, %59, %cst_60 {dimension_numbers = #tpu.dot_dimension_numbers<[1], [0], [0], [1], [0, 0, 1, 1], [], []>} : vector<8x4xf32>, vector<4x256xf32>, vector<8x256xf32> -> vector<8x256xf32>
    %61 = arith.addf %57, %60 : vector<8x256xf32>
    %c0_61 = arith.constant 0 : index
    %c0_62 = arith.constant 0 : index
    %62 = vector.load %arg7[%c0_61, %c0_62] : memref<8x256xf32, #tpu.memory_space<vmem>>, vector<8x256xf32>
    tpu.vector_store %arg7[%c0_61, %c0_62], %61 {strides = array<i32>} : memref<8x256xf32, #tpu.memory_space<vmem>>, vector<8x256xf32>,
    %c0_63 = arith.constant 0 : index
    %c0_64 = arith.constant 0 : index
    %63 = vector.load %arg7[%c0_63, %c0_64] : memref<8x256xf32, #tpu.memory_space<vmem>>, vector<8x256xf32>
    %c0_65 = arith.constant 0 : index
    %c0_66 = arith.constant 0 : index
    %c0_67 = arith.constant 0 : index
    %64 = vector.load %arg6[%c0_65, %c0_66, %c0_67] : memref<1x8x256xf32, #tpu.memory_space<vmem>>, vector<1x8x256xf32>
    %65 = vector.shape_cast %64 : vector<1x8x256xf32> to vector<8x256xf32>
    %66 = vector.shape_cast %63 : vector<8x256xf32> to vector<1x8x256xf32>
    tpu.vector_store %arg6[%c0_65, %c0_66, %c0_67], %66 {strides = array<i32>} : memref<1x8x256xf32, #tpu.memory_space<vmem>>, vector<1x8x256xf32>,
    return
  }
  func.func @transform_0(%arg0: i32, %arg1: i32) -> (i32, i32, i32) {
    %c0_i32 = arith.constant 0 : i32
    %c0_i32_0 = arith.constant 0 : i32
    return %arg0, %c0_i32, %arg1 : i32, i32, i32
  }
  func.func @transform_1(%arg0: i32, %arg1: i32) -> (i32, i32, i32) {
    %c1_i32 = arith.constant 1 : i32
    %0 = arith.addi %arg1, %c1_i32 : i32
    %c2_i32 = arith.constant 2 : i32
    %1 = arith.muli %0, %c2_i32 : i32
    %c1_i32_0 = arith.constant 1 : i32
    %2 = arith.minsi %1, %c1_i32_0 : i32
    %c0_i32 = arith.constant 0 : i32
    %c0_i32_1 = arith.constant 0 : i32
    return %arg0, %c0_i32, %2 : i32, i32, i32
  }
  func.func @transform_2(%arg0: i32, %arg1: i32) -> (i32, i32) {
    %c0_i32 = arith.constant 0 : i32
    %c0_i32_0 = arith.constant 0 : i32
    %c0_i32_1 = arith.constant 0 : i32
    return %c0_i32, %c0_i32_0 : i32, i32
  }
  func.func @transform_3(%arg0: i32, %arg1: i32) -> (i32, i32) {
    %c0_i32 = arith.constant 0 : i32
    %c0_i32_0 = arith.constant 0 : i32
    %c0_i32_1 = arith.constant 0 : i32
    return %c0_i32, %c0_i32_0 : i32, i32
  }
  func.func @transform_4(%arg0: i32, %arg1: i32) -> (i32, i32, i32) {
    %c0_i32 = arith.constant 0 : i32
    %c0_i32_0 = arith.constant 0 : i32
    return %arg0, %c0_i32, %arg1 : i32, i32, i32
  }
}

</mosaic_0001>

<bundles_post_ra>
// kernel: neg.1
= control target key start
LH: loop header
LB: loop body
LE: loop exit
PB: predicated region body
PF: predicated region fallthrough
CT: control target
= control target key end

     0   :  { %s152_s0 = inlined_call_operand.vmem [shape: f32[4,2,3,3], index: 0, kind: input, shape index: {}]   ;;  %s153_s1 = inlined_call_operand.vmem [shape: f32[4,2,3,3], index: 1, kind: output, shape index: {}]  }
   0x1   :  { %v2_v0 = vld [vmem:[%s152_s0] sm:$0x3]  ;;  %v72_v1 = vld [vmem:[%s152_s0 + $0x6] sm:$0x3]  ;;  %v74_v2 = vld [vmem:[%s152_s0 + $0xc] sm:$0x3] }
   0x2   :  { %v5_v3 = vxor.u32 2147483648, %v2_v0  ;;  %v12_v4 = vxor.u32 2147483648, %v72_v1  ;;  %v20_v5 = vxor.u32 2147483648, %v74_v2  ;;  %v76_v6 = vld [vmem:[%s152_s0 + $0x2] sm:$0x3] }
   0x3   :  { %v28_v7 = vxor.u32 2147483648, %v76_v6  ;;  %v78_v8 = vld [vmem:[%s152_s0 + $0x8] sm:$0x3]  ;;  %v80_v9 = vld [vmem:[%s152_s0 + $0xe] sm:$0x3] }
   0x4   :  { %7 = vst [vmem:[%s153_s1] sm:$0x3] %v5_v3  ;;  %73 = vst [vmem:[%s153_s1 + $0x6] sm:$0x3] %v12_v4  ;;  %v36_v10 = vxor.u32 2147483648, %v78_v8  ;;  %v44_v11 = vxor.u32 2147483648, %v80_v9 }
   0x5   :  { %75 = vst [vmem:[%s153_s1 + $0xc] sm:$0x3] %v20_v5  ;;  %v82_v12 = vld [vmem:[%s152_s0 + $0x4] sm:$0x3]  ;;  %v84_v13 = vld [vmem:[%s152_s0 + $0xa] sm:$0x3] }
   0x6   :  { %77 = vst [vmem:[%s153_s1 + $0x2] sm:$0x3] %v28_v7  ;;  %v52_v14 = vxor.u32 2147483648, %v82_v12  ;;  %v60_v15 = vxor.u32 2147483648, %v84_v13  ;;  %v86_v16 = vld [vmem:[%s152_s0 + $0x10] sm:$0x3] }
   0x7   :  { %79 = vst [vmem:[%s153_s1 + $0x8] sm:$0x3] %v36_v10  ;;  %81 = vst [vmem:[%s153_s1 + $0xe] sm:$0x3] %v44_v11  ;;  %v68_v17 = vxor.u32 2147483648, %v86_v16 }
   0x8   :  { %83 = vst [vmem:[%s153_s1 + $0x4] sm:$0x3] %v52_v14  ;;  %85 = vst [vmem:[%s153_s1 + $0xa] sm:$0x3] %v60_v15 }
   0x9   :  { %87 = vst [vmem:[%s153_s1 + $0x10] sm:$0x3] %v68_v17 }

// kernel: _lambda_.1
= control target key start
LH: loop header
LB: loop body
LE: loop exit
PB: predicated region body
PF: predicated region fallthrough
CT: control target
= control target key end

     0   :  { %s1443_s15 = smov 0   ;;  %s1445_s16 = smov 0   ;;  %s1544_s0 = inlined_call_operand.vmem [shape: f32[2,4,256], index: 0, kind: input, shape index: {}, may-alias: {0,1}]   ;;  %s1545_s1 = inlined_call_operand.vmem [shape: f32[2,4,256], index: 1, kind: input, shape index: {}, may-alias: {0,1}]   ;;  %s1546_s2 = inlined_call_operand.vmem [shape: f32[8,36], index: 2, kind: input, shape index: {}]   ;;  %s1547_s3 = inlined_call_operand.vmem [shape: f32[8,1], index: 3, kind: input, shape index: {}]   ;;  %s1548_s4 = inlined_call_operand.vmem [shape: f32[2,8,256], index: 4, kind: output, shape index: {}]  }
   0x1   :  { %s1447_s17 = smov 0  }
   0x2 LB: > { %s26_s18 = sadd.s32 1, %s1396_s16  ;;  %p1277_p0 = scmp.ge.s32.totalorder %s1400_s17, 1  ;;  %s1400_s17 = sphi %s1447_s17, %s14_s17   ;;  %s1396_s16 = sphi %s1445_s16, %s1550_s16   ;;  %s1392_s15 = sphi %s1443_s15, %s1549_s15  }
   0x3   : > { %p28_p1 = scmp.ge.s32.totalorder %s26_s18, 2  ;;  %p214_p2 = scmp.lt.s32.totalorder %s1400_s17, 3 }
   0x5   : > { %s1552_s18 = smov (%p28_p1, %s26_s18), 0  ;;  %p215_p3 = pnand %p1277_p0, %p214_p2 }
   0x6   : > { %v1464_v0 = vld [vmem:[%s1546_s2] sm:$0xff] (!%p215_p3)  ;;  %p261_p4 = scmp.lt.s32.totalorder (!%p215_p3), %s1392_s15, 1  ;;  %s1402_s21 = smov (!%p215_p3), 112   ;;  %v1403_v1 = vmov (!%p215_p3), 0.0   ;;  %vm315_vm0 = vcmask (!%p215_p3), 1043456   ;;  %vm311_vm1 = vcmask (!%p215_p3), 31744  }
   0x7   : > { %218 = sbr.rel (%p215_p3) target bundleno = 412 (0x19c), region = 36  ;;  %688 = vrot.lane.b32.xlu1 (!%p215_p3), %v1464_v0, %s1402_s21  ;;  %769 = vmatprep.mubr.f32.mxu0 (!%p215_p3), %v1403_v1  ;;  %s1404_s30 = smov (!%p215_p3), 111   ;;  %v1416_v5 = vmov (!%p215_p3), 0   ;;  %v300_v6 = vld [vmem:[%s1547_s3] sm:$0xff] (!%p215_p3)  ;;  %vm696_vm2 = vcmask (!%p215_p3), 908288   ;;  %vm792_vm3 = vcmask (!%p215_p3), 900096  }
   0x8   : > { %384 = vmatprep.mubr.f32.mxu1 (!%p215_p3), %v1403_v1  ;;  %s1405_s5 = smov (!%p215_p3), 110   ;;  %s1406_s6 = smov (!%p215_p3), 108   ;;  %1376 = vset.pattern.permute.xlu0 (!%p215_p3), %v1416_v5  ;;  %vm408_vm4 = vcmask (!%p215_p3), 1039360   ;;  %vm888_vm5 = vcmask (!%p215_p3), 785408   ;;  %vm504_vm6 = vcmask (!%p215_p3), 1031168   ;;  %vm984_vm7 = vcmask (!%p215_p3), 777216  }
   0x9   : > { %s1407_s7 = smov (!%p215_p3), 127   ;;  %s1408_s8 = smov (!%p215_p3), 96   ;;  %vm600_vm8 = vcmask (!%p215_p3), 916480   ;;  %vm1080_vm9 = vcmask (!%p215_p3), 769024  }
   0xa   : > { %s1409_s9 = smov (!%p215_p3), 124   ;;  %s1410_s10 = smov (!%p215_p3), 104  }
   0xb   : > { %s1411_s11 = smov (!%p215_p3), 126   ;;  %s1412_s12 = smov (!%p215_p3), 95  }
   0xc   : > { %s1413_s13 = smov (!%p215_p3), 120   ;;  %s1414_s14 = smov (!%p215_p3), 100  }
   0xd   : > { %s1415_s19 = smov (!%p215_p3), 94   ;;  %s1417_s20 = smov (!%p215_p3), 116  }
   0xe   : > { %s1554_s15 = smov (!%p261_p4, %s1392_s15), 1 }
   0xf   : > { %s1313_s22 = sshll.u32 %s1554_s15, 3 }
  0x10   : > { %s1315_s23 = sadd.s32 4, %s1313_s22  ;;  %s268_s26 = scalar_lea.vmem %s1544_s0, %s1313_s22 }
  0x11   : > { %s281_s29 = scalar_lea.vmem %s1545_s1, %s1315_s23  ;;  %v296_v2 = vld [vmem:[%s268_s26] sm:$0xff] }
  0x12   : > { %v297_v3 = vld [vmem:[%s281_s29] sm:$0xf]  ;;  %690 = vrot.lane.b32.xlu1 %v296_v2, %s1404_s30  ;;  %v299_v4 = vcombine.high %v296_v2, %v296_v2 }
  0x13   : > { %694 = vrot.lane.b32.xlu0 %v297_v3, %s1404_s30 }
  0x14   : > { %1284 = vmatprep.subr.msk.mxu1 %vm315_vm0, %v299_v4 }
  0x15   : > { %1285 = vmatpush1.msk.msra.mxu1 %vm315_vm0, %v296_v2 }
  0x16   : > { %790 = vrot.lane.b32.xlu1 %v297_v3, %s1405_s5  ;;  %1286 = vmatmul.mubr.msk.f32.vlgmr.msra.gmra.mrb[0].mxu1 %vm311_vm1, %v1464_v0 }
  0x17   : > { %692 = vrot.lane.b32.xlu0 %v299_v4, %s1404_s30  ;;  %481 = vmatprep.mubr.f32.mxu1 %v1403_v1 }
  0x1a   : > { %784 = vrot.lane.b32.xlu1 %v1464_v0, %s1406_s6 }
  0x1b   : > { %788 = vrot.lane.b32.xlu0 %v299_v4, %s1405_s5 }
  0x1e   : > { %406 = vrot.lane.b32.xlu1 %v297_v3, %s1407_s7 }
  0x1f   : > { %786 = vrot.lane.b32.xlu0 %v296_v2, %s1405_s5 }
  0x22   : > { %884 = vrot.lane.b32.xlu1 %v299_v4, %s1408_s8 }
  0x23   : > { %404 = vrot.lane.b32.xlu0 %v299_v4, %s1407_s7 }
  0x26   : > { %399 = vrot.lane.b32.xlu1 %v1464_v0, %s1409_s9 }
  0x27   : > { %402 = vrot.lane.b32.xlu0 %v296_v2, %s1407_s7 }
  0x2a   : > { %880 = vrot.lane.b32.xlu1 %v1464_v0, %s1410_s10 }
  0x2b   : > { %886 = vrot.lane.b32.xlu0 %v297_v3, %s1408_s8 }
  0x2e   : > { %502 = vrot.lane.b32.xlu1 %v297_v3, %s1411_s11 }
  0x2f   : > { %882 = vrot.lane.b32.xlu0 %v296_v2, %s1408_s8 }
  0x32   : > { %980 = vrot.lane.b32.xlu1 %v299_v4, %s1412_s12 }
  0x33   : > { %500 = vrot.lane.b32.xlu0 %v299_v4, %s1411_s11 }
  0x36   : > { %496 = vrot.lane.b32.xlu1 %v1464_v0, %s1413_s13 }
  0x37   : > { %498 = vrot.lane.b32.xlu0 %v296_v2, %s1411_s11 }
  0x3a   : > { %976 = vrot.lane.b32.xlu1 %v1464_v0, %s1414_s14 }
  0x3b   : > { %982 = vrot.lane.b32.xlu0 %v297_v3, %s1412_s12 }
  0x3e   : > { %598 = vrot.lane.b32.xlu1 %v297_v3, %s1402_s21 }
  0x3f   : > { %978 = vrot.lane.b32.xlu0 %v296_v2, %s1412_s12 }
  0x42   : > { %1076 = vrot.lane.b32.xlu1 %v299_v4, %s1415_s19 }
  0x43   : > { %596 = vrot.lane.b32.xlu0 %v299_v4, %s1402_s21 }
  0x46   : > { %592 = vrot.lane.b32.xlu1 %v1464_v0, %s1417_s20 }
  0x47   : > { %594 = vrot.lane.b32.xlu0 %v296_v2, %s1402_s21  ;;  %s1316_s21 = sshll.u32 %s1554_s15, 4 }
  0x48   : > { %s294_s26 = scalar_lea.vmem %s1548_s4, %s1316_s21 }
  0x4a   : > { %1072 = vrot.lane.b32.xlu1 %v1464_v0, %s1408_s8 }
  0x4b   : > { %1078 = vrot.lane.b32.xlu0 %v297_v3, %s1415_s19 }
  0x4f   : > { %1074 = vrot.lane.b32.xlu0 %v296_v2, %s1415_s19 }
  0x53   : > { %303 = vperm.xlu0 %1376, %v300_v6  }
  0x79   : > { %v689_v7 = vpop.permute.xlu1 %688 }
  0x84   : > { %v691_v8 = vpop.permute.xlu1 %690 }
  0x85   : > { %v695_v9 = vpop.permute.xlu0 %694 }
  0x88   : > { %v791_v10 = vpop.permute.xlu1 %790 }
  0x89   : > { %v693_v11 = vpop.permute.xlu0 %692 }
  0x8a   : > { %v698_v12 = vsel %vm696_vm2, %v693_v11, %v695_v9  ;;  %v697_v13 = vsel %vm696_vm2, %v691_v8, %v693_v11 }
  0x8b   : > { %1296 = vmatprep.subr.msk.mxu0 %vm315_vm0, %v698_v12 }
  0x8c   : > { %1297 = vmatpush1.msk.msra.mxu0 %vm315_vm0, %v697_v13  ;;  %v785_v14 = vpop.permute.xlu1 %784 }
  0x8d   : > { %1298 = vmatmul.mubr.msk.f32.vlgmr.msra.gmra.mrb[0].mxu0 %vm311_vm1, %v689_v7  ;;  %v789_v15 = vpop.permute.xlu0 %788 }
  0x8e   : > { %v794_v16 = vsel %vm792_vm3, %v789_v15, %v791_v10  ;;  %865 = vmatprep.mubr.f32.mxu0 %v1403_v1 }
  0x8f   : > { %1299 = vmatprep.subr.msk.mxu0 %vm315_vm0, %v794_v16 }
  0x90   : > { %v407_v17 = vpop.permute.xlu1 %406 }
  0x91   : > { %v787_v18 = vpop.permute.xlu0 %786 }
  0x92   : > { %v793_v19 = vsel %vm792_vm3, %v787_v18, %v789_v15 }
  0x93   : > { %1300 = vmatpush1.msk.msra.mxu0 %vm315_vm0, %v793_v19 }
  0x94   : > { %v885_v20 = vpop.permute.xlu1 %884 }
  0x95   : > { %v405_v21 = vpop.permute.xlu0 %404  ;;  %1301 = vmatmul.mubr.msk.f32.vlgmr.msra.gmra.mrb[0].mxu0 %vm311_vm1, %v785_v14 }
  0x96   : > { %v410_v22 = vsel %vm408_vm4, %v405_v21, %v407_v17  ;;  %961 = vmatprep.mubr.f32.mxu0 %v1403_v1 }
  0x97   : > { %1287 = vmatprep.subr.msk.mxu1 %vm315_vm0, %v410_v22 }
  0x98   : > { %v400_v23 = vpop.permute.xlu1 %399 }
  0x99   : > { %v403_v24 = vpop.permute.xlu0 %402 }
  0x9a   : > { %v409_v25 = vsel %vm408_vm4, %v403_v24, %v405_v21 }
  0x9b   : > { %1288 = vmatpush1.msk.msra.mxu1 %vm315_vm0, %v409_v25 }
  0x9c   : > { %v881_v26 = vpop.permute.xlu1 %880  ;;  %1289 = vmatmul.mubr.msk.f32.vlgmr.msra.gmra.mrb[0].mxu1 %vm311_vm1, %v400_v23 }
  0x9d   : > { %v887_v27 = vpop.permute.xlu0 %886  ;;  %577 = vmatprep.mubr.f32.mxu1 %v1403_v1 }
  0x9e   : > { %v890_v28 = vsel %vm888_vm5, %v885_v20, %v887_v27 }
  0x9f   : > { %1302 = vmatprep.subr.msk.mxu0 %vm315_vm0, %v890_v28 }
  0xa0   : > { %v503_v29 = vpop.permute.xlu1 %502 }
  0xa1   : > { %v883_v30 = vpop.permute.xlu0 %882 }
  0xa2   : > { %v889_v31 = vsel %vm888_vm5, %v883_v30, %v885_v20 }
  0xa3   : > { %1303 = vmatpush1.msk.msra.mxu0 %vm315_vm0, %v889_v31 }
  0xa4   : > { %v981_v32 = vpop.permute.xlu1 %980  ;;  %1304 = vmatmul.mubr.msk.f32.vlgmr.msra.gmra.mrb[0].mxu0 %vm311_vm1, %v881_v26 }
  0xa5   : > { %v501_v33 = vpop.permute.xlu0 %500  ;;  %1057 = vmatprep.mubr.f32.mxu0 %v1403_v1 }
  0xa6   : > { %v506_v34 = vsel %vm504_vm6, %v501_v33, %v503_v29 }
  0xa7   : > { %1290 = vmatprep.subr.msk.mxu1 %vm315_vm0, %v506_v34 }
  0xa8   : > { %v497_v35 = vpop.permute.xlu1 %496 }
  0xa9   : > { %v499_v36 = vpop.permute.xlu0 %498 }
  0xaa   : > { %v505_v37 = vsel %vm504_vm6, %v499_v36, %v501_v33 }
  0xab   : > { %1291 = vmatpush1.msk.msra.mxu1 %vm315_vm0, %v505_v37 }
  0xac   : > { %v977_v38 = vpop.permute.xlu1 %976  ;;  %1292 = vmatmul.mubr.msk.f32.vlgmr.msra.gmra.mrb[0].mxu1 %vm311_vm1, %v497_v35 }
  0xad   : > { %v983_v39 = vpop.permute.xlu0 %982  ;;  %673 = vmatprep.mubr.f32.mxu1 %v1403_v1 }
  0xae   : > { %v986_v40 = vsel %vm984_vm7, %v981_v32, %v983_v39 }
  0xaf   : > { %1305 = vmatprep.subr.msk.mxu0 %vm315_vm0, %v986_v40 }
  0xb0   : > { %v599_v41 = vpop.permute.xlu1 %598 }
  0xb1   : > { %v979_v42 = vpop.permute.xlu0 %978 }
  0xb2   : > { %v985_v43 = vsel %vm984_vm7, %v979_v42, %v981_v32 }
  0xb3   : > { %1306 = vmatpush1.msk.msra.mxu0 %vm315_vm0, %v985_v43 }
  0xb4   : > { %v1077_v44 = vpop.permute.xlu1 %1076  ;;  %1307 = vmatmul.mubr.msk.f32.vlgmr.msra.gmra.mrb[0].mxu0 %vm311_vm1, %v977_v38 }
  0xb5   : > { %v597_v45 = vpop.permute.xlu0 %596  ;;  %1153 = vmatprep.mubr.f32.mxu0 %v1403_v1 }
  0xb6   : > { %v602_v46 = vsel %vm600_vm8, %v597_v45, %v599_v41 }
  0xb7   : > { %1293 = vmatprep.subr.msk.mxu1 %vm315_vm0, %v602_v46 }
  0xb8   : > { %v593_v48 = vpop.permute.xlu1 %592 }
  0xb9   : > { %v595_v47 = vpop.permute.xlu0 %594 }
  0xba   : > { %v601_v49 = vsel %vm600_vm8, %v595_v47, %v597_v45 }
  0xbb   : > { %1294 = vmatpush1.msk.msra.mxu1 %vm315_vm0, %v601_v49 }
  0xbc   : > { %1295 = vmatmul.mubr.msk.f32.vlgmr.msra.gmra.mrb[0].mxu1 %vm311_vm1, %v593_v48  ;;  %v1073_v53 = vpop.permute.xlu1 %1072 }
  0xbd   : > { %v1079_v50 = vpop.permute.xlu0 %1078 }
  0xbe   : > { %v1082_v51 = vsel %vm1080_vm9, %v1077_v44, %v1079_v50 }
  0xbf   : > { %1308 = vmatprep.subr.msk.mxu0 %vm315_vm0, %v1082_v51 }
  0xc1   : > { %v1075_v52 = vpop.permute.xlu0 %1074 }
  0xc2   : > { %v1081_v54 = vsel %vm1080_vm9, %v1075_v52, %v1077_v44 }
  0xc3   : > { %1309 = vmatpush1.msk.msra.mxu0 %vm315_vm0, %v1081_v54 }
  0xc4   : > { %1310 = vmatmul.mubr.msk.f32.vlgmr.msra.gmra.mrb[0].mxu0 %vm311_vm1, %v1073_v53 }
  0xd2   : > { %v304_v57 = vpop.permute.xlu0 %303 }
 0x18f   : > { %v675_v55 = vpop.f32.mrb[0].mxu1 }
 0x190   : > { %v677_v56 = vpop.f32.mrb[1].mxu1  ;;  %v1318_v58 = vadd.f32 %v675_v55, %v304_v57 }
 0x191   : > { %v1320_v59 = vadd.f32 %v677_v56, %v304_v57 }
 0x197   : > { %v1155_v60 = vpop.f32.mrb[0].mxu0 }
 0x198   : > { %v1319_v61 = vadd.f32 %v1318_v58, %v1155_v60  ;;  %v1157_v62 = vpop.f32.mrb[1].mxu0 }
 0x199   : > { %v1321_v63 = vadd.f32 %v1320_v59, %v1157_v62 }
 0x19a   : > { %1166 = vst [vmem:[%s294_s26] sm:$0xff] %v1319_v61 }
 0x19b   : > { %1167 = vst [vmem:[%s294_s26 + $0x8] sm:$0xff] %v1321_v63 }
 0x19c PF: > { %s14_s17 = sadd.s32 1, %s1400_s17   ;;  %s1549_s15 = smov %s1396_s16 }
 0x19d   : > { %p11_p5 = scmp.ge.s32.totalorder %s14_s17, 4   ;;  %s1550_s16 = smov %s1552_s18 }
 0x19f   :  { %13 = sbr.rel (!%p11_p5) target bundleno = 2 (0x2), region = 69 }

</bundles_post_ra>
